<compile_context>
chip_gen: v6e
topology: v6e:2x2x1
jax: 0.10.0
libtpu: 0.0.40
codegen_flags: <defaults>
</compile_context>

<pallas_src>
import jax
import jax.numpy as jnp
from jax.experimental import pallas as pl
from jax.experimental.pallas import tpu as pltpu

LINEARITY = 1.0
ON_OFF_RATIO = 1.57
READ_NOISE_STD = 4.31e-08
SYMMETRY = True

GMIN = 1.0 / ON_OFF_RATIO
GMAX = 1.0
DELTA_G = GMAX - GMIN

HIDDEN = 128  # fc1/fc2 width (fixed by the module) == TPU lane width


def make_dqn_kernel(n_obs_p: int, hidden: int):
    """Kernel factory closing over the (static) row offsets inside the weight slab."""
    r1 = n_obs_p                 # end of fc1 weights (n_obs_p, hidden)
    r2 = n_obs_p + hidden        # end of fc2 weights (hidden, hidden)
    r3 = n_obs_p + 2 * hidden    # end of fc3 weights (hidden, hidden-padded)

    def dqn_kernel(x_ref, w_ref, b_ref, out_ref):
        x = x_ref[...]                                             # (B, n_obs_p)
        h1 = jnp.maximum(
            jnp.dot(x, w_ref[0:r1, :], preferred_element_type=jnp.float32)
            + b_ref[0:1, :],
            0.0,
        )                                                          # (B, 128)
        h2 = jnp.maximum(
            jnp.dot(h1, w_ref[r1:r2, :], preferred_element_type=jnp.float32)
            + b_ref[1:2, :],
            0.0,
        )                                                          # (B, 128)
        out_ref[...] = (
            jnp.dot(h2, w_ref[r2:r3, :], preferred_element_type=jnp.float32)
            + b_ref[2:3, :]
        )                                                          # (B, 128) lane-dense

    return dqn_kernel


def hardware_dqn_forward(x, params, noises):
    """x: (B, n_obs) f32. params: torch-layout weights (out,in), biases (1,out).
    noises: std-normal arrays with the same shapes as the weights."""
    B, n_obs = x.shape
    n_act = params["w3"].shape[0]
    lane = HIDDEN

    # Pad the observation dim to a multiple of 8 so every weight-slab slice is
    # sublane-aligned (zeros contribute nothing to the matmul).
    n_obs_p = max(8, ((n_obs + 7) // 8) * 8)

    # Conductance mapping is an exact identity (LINEARITY=1, SYMMETRY=True):
    # effective weight = w + noise * READ_NOISE_STD.  Fuse noise here (one XLA
    # add per layer) and transpose to (in_features, out_features).
    nw1 = (params["w1"] + noises["n1"] * READ_NOISE_STD).T          # (n_obs, 128)
    nw2 = (params["w2"] + noises["n2"] * READ_NOISE_STD).T          # (128, 128)
    nw3 = (params["w3"] + noises["n3"] * READ_NOISE_STD).T          # (128, n_act)

    nw1 = jnp.pad(nw1, ((0, n_obs_p - n_obs), (0, 0)))              # (n_obs_p, 128)
    nw3 = jnp.pad(nw3, ((0, 0), (0, lane - n_act)))                 # (128, 128) lane-dense out

    w_slab = jnp.concatenate([nw1, nw2, nw3], axis=0)               # (n_obs_p+256, 128)

    b3p = jnp.pad(params["b3"], ((0, 0), (0, lane - n_act)))        # (1, 128)
    b_slab = jnp.concatenate([params["b1"], params["b2"], b3p], 0)  # (3, 128)

    xp = jnp.pad(x, ((0, 0), (0, n_obs_p - n_obs)))                 # (B, n_obs_p)

    vmem = pl.BlockSpec(memory_space=pltpu.MemorySpace.VMEM)
    out_padded = pl.pallas_call(
        make_dqn_kernel(n_obs_p, HIDDEN),
        out_shape=jax.ShapeDtypeStruct((B, lane), jnp.float32),
        in_specs=[vmem, vmem, vmem],
        out_specs=vmem,
    )(xp, w_slab, b_slab)

    return out_padded[:, :n_act]


def init_params(key, n_obs, n_act):
    """Torch nn.Linear-style init: weights (out,in), biases (1,out), uniform +/- 1/sqrt(fan_in)."""
    def linear_init(k, out_f, in_f):
        kw, kb = jax.random.split(k)
        bound = 1.0 / jnp.sqrt(jnp.float32(in_f))
        w = jax.random.uniform(kw, (out_f, in_f), jnp.float32, -bound, bound)
        b = jax.random.uniform(kb, (1, out_f), jnp.float32, -bound, bound)
        return w, b

    k1, k2, k3 = jax.random.split(key, 3)
    w1, b1 = linear_init(k1, HIDDEN, n_obs)
    w2, b2 = linear_init(k2, HIDDEN, HIDDEN)
    w3, b3 = linear_init(k3, n_act, HIDDEN)
    return {"w1": w1, "b1": b1, "w2": w2, "b2": b2, "w3": w3, "b3": b3}


def init_read_noise(key, n_obs, n_act):
    kn1, kn2, kn3 = jax.random.split(key, 3)
    return {
        "n1": jax.random.normal(kn1, (HIDDEN, n_obs), jnp.float32),
        "n2": jax.random.normal(kn2, (HIDDEN, HIDDEN), jnp.float32),
        "n3": jax.random.normal(kn3, (n_act, HIDDEN), jnp.float32),
    }


if __name__ == "__main__":
    # Small shapes consistent with the module: n_obs=8 observations, n_act=4 actions, batch=2.
    B, n_obs, n_act = 2, 8, 4

    key = jax.random.PRNGKey(0)
    kx, kp, kn = jax.random.split(key, 3)

    x = jax.random.normal(kx, (B, n_obs), jnp.float32)
    params = init_params(kp, n_obs, n_act)
    noises = init_read_noise(kn, n_obs, n_act)

    fwd = jax.jit(hardware_dqn_forward)
    out = jax.block_until_ready(fwd(x, params, noises))

    # Pure-JAX reference of the ORIGINAL module math (full conductance mapping).
    def ref_linear(xv, w, b, n):
        gp = 0.5 * (jnp.abs(w) + w) * DELTA_G + GMIN
        gn = 0.5 * (jnp.abs(w) - w) * DELTA_G + GMIN
        nw = (gp - gn) / DELTA_G + n * READ_NOISE_STD
        return xv @ nw.T + b

    h1 = jnp.maximum(ref_linear(x, params["w1"], params["b1"], noises["n1"]), 0.0)
    h2 = jnp.maximum(ref_linear(h1, params["w2"], params["b2"], noises["n2"]), 0.0)
    ref = ref_linear(h2, params["w3"], params["b3"], noises["n3"])

    assert out.shape == (B, n_act)
    assert jnp.allclose(out, ref, atol=1e-5, rtol=1e-5)
    print("KERNEL_OK")
</pallas_src>

<mosaic_0001>
module attributes {stable_mosaic.version = 11 : i64} {
  func.func @dqn_kernel(%arg0: memref<2x8xf32, #tpu.memory_space<vmem>>, %arg1: memref<264x128xf32, #tpu.memory_space<vmem>>, %arg2: memref<3x128xf32, #tpu.memory_space<vmem>>, %arg3: memref<2x128xf32, #tpu.memory_space<vmem>>) attributes {dimension_semantics = [], scalar_prefetch = 0 : i64, scratch_operands = 0 : i64, tpu.core_type = #tpu.core_type<tc>} {
    %c0 = arith.constant 0 : index
    %c0_0 = arith.constant 0 : index
    %0 = vector.load %arg0[%c0, %c0_0] : memref<2x8xf32, #tpu.memory_space<vmem>>, vector<2x8xf32>
    %c0_1 = arith.constant 0 : index
    %c0_2 = arith.constant 0 : index
    %1 = vector.load %arg1[%c0_1, %c0_2] : memref<264x128xf32, #tpu.memory_space<vmem>>, vector<8x128xf32>
    %cst = arith.constant dense<0.000000e+00> : vector<2x128xf32>
    %2 = tpu.matmul %0, %1, %cst {dimension_numbers = #tpu.dot_dimension_numbers<[1], [0], [0], [1], [0, 0, 1, 1], [], []>} : vector<2x8xf32>, vector<8x128xf32>, vector<2x128xf32> -> vector<2x128xf32>
    %c0_3 = arith.constant 0 : index
    %c0_4 = arith.constant 0 : index
    %3 = vector.load %arg2[%c0_3, %c0_4] : memref<3x128xf32, #tpu.memory_space<vmem>>, vector<1x128xf32>
    %4 = vector.broadcast %3 : vector<1x128xf32> to vector<2x128xf32>
    %5 = arith.addf %2, %4 : vector<2x128xf32>
    %cst_5 = arith.constant 0.000000e+00 : f32
    %6 = vector.broadcast %cst_5 : f32 to vector<2x128xf32>
    %7 = arith.maximumf %5, %6 : vector<2x128xf32>
    %c8 = arith.constant 8 : index
    %c0_6 = arith.constant 0 : index
    %8 = vector.load %arg1[%c8, %c0_6] : memref<264x128xf32, #tpu.memory_space<vmem>>, vector<128x128xf32>
    %cst_7 = arith.constant dense<0.000000e+00> : vector<2x128xf32>
    %9 = tpu.matmul %7, %8, %cst_7 {dimension_numbers = #tpu.dot_dimension_numbers<[1], [0], [0], [1], [0, 0, 1, 1], [], []>} : vector<2x128xf32>, vector<128x128xf32>, vector<2x128xf32> -> vector<2x128xf32>
    %c1 = arith.constant 1 : index
    %c0_8 = arith.constant 0 : index
    %10 = vector.load %arg2[%c1, %c0_8] : memref<3x128xf32, #tpu.memory_space<vmem>>, vector<1x128xf32>
    %11 = vector.broadcast %10 : vector<1x128xf32> to vector<2x128xf32>
    %12 = arith.addf %9, %11 : vector<2x128xf32>
    %cst_9 = arith.constant 0.000000e+00 : f32
    %13 = vector.broadcast %cst_9 : f32 to vector<2x128xf32>
    %14 = arith.maximumf %12, %13 : vector<2x128xf32>
    %c136 = arith.constant 136 : index
    %c0_10 = arith.constant 0 : index
    %15 = vector.load %arg1[%c136, %c0_10] : memref<264x128xf32, #tpu.memory_space<vmem>>, vector<128x128xf32>
    %cst_11 = arith.constant dense<0.000000e+00> : vector<2x128xf32>
    %16 = tpu.matmul %14, %15, %cst_11 {dimension_numbers = #tpu.dot_dimension_numbers<[1], [0], [0], [1], [0, 0, 1, 1], [], []>} : vector<2x128xf32>, vector<128x128xf32>, vector<2x128xf32> -> vector<2x128xf32>
    %c2 = arith.constant 2 : index
    %c0_12 = arith.constant 0 : index
    %17 = vector.load %arg2[%c2, %c0_12] : memref<3x128xf32, #tpu.memory_space<vmem>>, vector<1x128xf32>
    %18 = vector.broadcast %17 : vector<1x128xf32> to vector<2x128xf32>
    %19 = arith.addf %16, %18 : vector<2x128xf32>
    %c0_13 = arith.constant 0 : index
    %c0_14 = arith.constant 0 : index
    %20 = vector.load %arg3[%c0_13, %c0_14] : memref<2x128xf32, #tpu.memory_space<vmem>>, vector<2x128xf32>
    tpu.vector_store %arg3[%c0_13, %c0_14], %19 {strides = array<i32>} : memref<2x128xf32, #tpu.memory_space<vmem>>, vector<2x128xf32>,
    return
  }
}

</mosaic_0001>

<bundles_post_ra>
// kernel: hardware_dqn_forward.1
= control target key start
LH: loop header
LB: loop body
LE: loop exit
PB: predicated region body
PF: predicated region fallthrough
CT: control target
= control target key end

     0   :  { %vm22_vm0 = vcmask 64512   ;;  %v435_v2 = vmov 0.0   ;;  %vm436_vm1 = vmmov 0   ;;  %s611_s0 = inlined_call_operand.vmem [shape: f32[2,8], index: 0, kind: input, shape index: {}]   ;;  %s612_s1 = inlined_call_operand.vmem [shape: f32[264,128], index: 1, kind: input, shape index: {}]   ;;  %s613_s2 = inlined_call_operand.vmem [shape: f32[3,128], index: 2, kind: input, shape index: {}]   ;;  %s614_s3 = inlined_call_operand.hbm [shape: f32[2,128], index: 3, kind: output, shape index: {}]  }
   0x1   :  { %v16_v0 = vld [vmem:[%s612_s1] sm:$0xff]  ;;  %335 = vmatprep.subr.mxu0 %v435_v2  ;;  %337 = vmatprep.mubr.msk.f32.mxu0 %vm436_vm1, %v435_v2  ;;  %v111_v4 = vld [vmem:[%s612_s1 + $0x78] sm:$0xff]  ;;  %v110_v5 = vld [vmem:[%s612_s1 + $0x70] sm:$0xff] }
   0x2   :  { %v15_v1 = vld [vmem:[%s611_s0] sm:$0x3]  ;;  %336 = vmatpush3.msra.mxu0 %v16_v0  ;;  %340 = vmatprep.subr.mxu1 %v435_v2 }
   0x3   :  { %v112_v3 = vld [vmem:[%s612_s1 + $0x80] sm:$0xff]  ;;  %338 = vmatmul.mubr.msk.f32.vlgmr.msra.gmra.mxu0 %vm22_vm0, %v15_v1  ;;  %372 = vmatprep.mubr.msk.f32.mxu1 %vm436_vm1, %v435_v2 }
   0x4   :  { %341 = vmatpush3.msra.mxu1 %v112_v3  ;;  %375 = vmatprep.subr.mxu0 %v435_v2 }
   0x5   :  { %342 = vmatprep.subr.mxu1 %v435_v2 }
   0x6   :  { %343 = vmatpush3.msra.mxu1 %v111_v4 }
   0x7   :  { %8 = vsyncpa [#allocation3], 0  ;;  %344 = vmatprep.subr.mxu1 %v435_v2  ;;  %v109_v6 = vld [vmem:[%s612_s1 + $0x68] sm:$0xff]  ;;  %407 = vmatprep.mubr.msk.f32.mxu0 %vm436_vm1, %v435_v2  ;;  %v108_v7 = vld [vmem:[%s612_s1 + $0x60] sm:$0xff]  ;;  %s437_s29 = smov [#allocation2]  }
   0x8   :  { %345 = vmatpush3.msra.mxu1 %v110_v5  ;;  %v107_v8 = vld [vmem:[%s612_s1 + $0x58] sm:$0xff]  ;;  %v106_v9 = vld [vmem:[%s612_s1 + $0x50] sm:$0xff]  ;;  %v105_v10 = vld [vmem:[%s612_s1 + $0x48] sm:$0xff]  ;;  %s287_s30 = sshll.u32 %s437_s29, 4  ;;  %s288_s30 = int_to_ptr.vmem [resolvable:$true] %s287_s30 }
   0x9   :  { %346 = vmatprep.subr.mxu1 %v435_v2  ;;  %v104_v11 = vld [vmem:[%s612_s1 + $0x40] sm:$0xff]  ;;  %v103_v12 = vld [vmem:[%s612_s1 + $0x38] sm:$0xff]  ;;  %v102_v13 = vld [vmem:[%s612_s1 + $0x30] sm:$0xff]  ;;  %p418_p1 = scmp.lt.s32.totalorder %s288_s30, %s288_s30 }
   0xa   :  { %347 = vmatpush3.msra.mxu1 %v109_v6  ;;  %v101_v14 = vld [vmem:[%s612_s1 + $0x28] sm:$0xff]  ;;  %v100_v15 = vld [vmem:[%s612_s1 + $0x20] sm:$0xff]  ;;  %v99_v16 = vld [vmem:[%s612_s1 + $0x18] sm:$0xff] }
   0xb   :  { %348 = vmatprep.subr.mxu1 %v435_v2  ;;  %v98_v17 = vld [vmem:[%s612_s1 + $0x10] sm:$0xff]  ;;  %v97_v18 = vld [vmem:[%s612_s1 + $0x8] sm:$0xff]  ;;  %v204_v19 = vld [vmem:[%s612_s1 + $0x100] sm:$0xff] }
   0xc   :  { %349 = vmatpush3.msra.mxu1 %v108_v7  ;;  %v203_v20 = vld [vmem:[%s612_s1 + $0xf8] sm:$0xff]  ;;  %376 = vmatpush3.msra.mxu0 %v204_v19  ;;  %v202_v21 = vld [vmem:[%s612_s1 + $0xf0] sm:$0xff]  ;;  %v201_v22 = vld [vmem:[%s612_s1 + $0xe8] sm:$0xff] }
   0xd   :  { %350 = vmatprep.subr.mxu1 %v435_v2  ;;  %377 = vmatprep.subr.mxu0 %v435_v2  ;;  %v200_v23 = vld [vmem:[%s612_s1 + $0xe0] sm:$0xff]  ;;  %v199_v24 = vld [vmem:[%s612_s1 + $0xd8] sm:$0xff]  ;;  %v198_v25 = vld [vmem:[%s612_s1 + $0xd0] sm:$0xff] }
   0xe   :  { %351 = vmatpush3.msra.mxu1 %v107_v8  ;;  %378 = vmatpush3.msra.mxu0 %v203_v20  ;;  %v197_v26 = vld [vmem:[%s612_s1 + $0xc8] sm:$0xff]  ;;  %v196_v27 = vld [vmem:[%s612_s1 + $0xc0] sm:$0xff]  ;;  %v195_v28 = vld [vmem:[%s612_s1 + $0xb8] sm:$0xff] }
   0xf   :  { %352 = vmatprep.subr.mxu1 %v435_v2  ;;  %379 = vmatprep.subr.mxu0 %v435_v2  ;;  %v194_v29 = vld [vmem:[%s612_s1 + $0xb0] sm:$0xff]  ;;  %v193_v30 = vld [vmem:[%s612_s1 + $0xa8] sm:$0xff]  ;;  %v192_v31 = vld [vmem:[%s612_s1 + $0xa0] sm:$0xff] }
  0x10   :  { %353 = vmatpush3.msra.mxu1 %v106_v9  ;;  %380 = vmatpush3.msra.mxu0 %v202_v21  ;;  %v295_v32 = vld [vmem:[%s613_s2] ss:$0 sm:$0xff]  ;;  %v191_v37 = vld [vmem:[%s612_s1 + $0x98] sm:$0xff]  ;;  %v190_v38 = vld [vmem:[%s612_s1 + $0x90] sm:$0xff] }
  0x11   :  { %354 = vmatprep.subr.mxu1 %v435_v2  ;;  %381 = vmatprep.subr.mxu0 %v435_v2  ;;  %v189_v39 = vld [vmem:[%s612_s1 + $0x88] sm:$0xff]  ;;  %v297_v40 = vld [vmem:[%s613_s2 + $0x1] ss:$0 sm:$0xff]  ;;  %v298_v45 = vld [vmem:[%s613_s2 + $0x2] ss:$0 sm:$0xff]  ;;  %s413_s1 = scalar_lea.vmem %s288_s30, 32 }
  0x12   :  { %355 = vmatpush3.msra.mxu1 %v105_v10  ;;  %382 = vmatpush3.msra.mxu0 %v201_v22  ;;  %p414_p0 = scmp.ne.s32.totalorder %s288_s30, %s413_s1  ;;  %p419_p2 = scmp.lt.s32.totalorder %s413_s1, %s413_s1 }
  0x13   :  { %356 = vmatprep.subr.mxu1 %v435_v2  ;;  %383 = vmatprep.subr.mxu0 %v435_v2 }
  0x14   :  { %357 = vmatpush3.msra.mxu1 %v104_v11  ;;  %384 = vmatpush3.msra.mxu0 %v200_v23  ;;  %p420_p3 = por %p419_p2, %p418_p1 }
  0x15   :  { %358 = vmatprep.subr.mxu1 %v435_v2  ;;  %385 = vmatprep.subr.mxu0 %v435_v2 }
  0x16   :  { %359 = vmatpush3.msra.mxu1 %v103_v12  ;;  %386 = vmatpush3.msra.mxu0 %v199_v24  ;;  %p421_p4 = pnand %p420_p3, %p414_p0 }
  0x17   :  { %360 = vmatprep.subr.mxu1 %v435_v2  ;;  %387 = vmatprep.subr.mxu0 %v435_v2 }
  0x18   :  { %361 = vmatpush3.msra.mxu1 %v102_v13  ;;  %388 = vmatpush3.msra.mxu0 %v198_v25 }
  0x19   :  { %362 = vmatprep.subr.mxu1 %v435_v2  ;;  %389 = vmatprep.subr.mxu0 %v435_v2 }
  0x1a   :  { %363 = vmatpush3.msra.mxu1 %v101_v14  ;;  %390 = vmatpush3.msra.mxu0 %v197_v26 }
  0x1b   :  { %364 = vmatprep.subr.mxu1 %v435_v2  ;;  %391 = vmatprep.subr.mxu0 %v435_v2 }
  0x1c   :  { %365 = vmatpush3.msra.mxu1 %v100_v15  ;;  %392 = vmatpush3.msra.mxu0 %v196_v27 }
  0x1d   :  { %366 = vmatprep.subr.mxu1 %v435_v2  ;;  %393 = vmatprep.subr.mxu0 %v435_v2 }
  0x1e   :  { %367 = vmatpush3.msra.mxu1 %v99_v16  ;;  %394 = vmatpush3.msra.mxu0 %v195_v28 }
  0x1f   :  { %368 = vmatprep.subr.mxu1 %v435_v2  ;;  %395 = vmatprep.subr.mxu0 %v435_v2 }
  0x20   :  { %369 = vmatpush3.msra.mxu1 %v98_v17  ;;  %396 = vmatpush3.msra.mxu0 %v194_v29 }
  0x21   :  { %370 = vmatprep.subr.mxu1 %v435_v2  ;;  %397 = vmatprep.subr.mxu0 %v435_v2 }
  0x22   :  { %371 = vmatpush3.msra.mxu1 %v97_v18  ;;  %398 = vmatpush3.msra.mxu0 %v193_v30 }
  0x23   :  { %399 = vmatprep.subr.mxu0 %v435_v2 }
  0x24   :  { %400 = vmatpush3.msra.mxu0 %v192_v31 }
  0x25   :  { %401 = vmatprep.subr.mxu0 %v435_v2 }
  0x26   :  { %402 = vmatpush3.msra.mxu0 %v191_v37 }
  0x27   :  { %403 = vmatprep.subr.mxu0 %v435_v2 }
  0x28   :  { %404 = vmatpush3.msra.mxu0 %v190_v38 }
  0x29   :  { %405 = vmatprep.subr.mxu0 %v435_v2 }
  0x2a   :  { %406 = vmatpush3.msra.mxu0 %v189_v39 }
  0xc3   :  { %v92_v33 = vpop.f32.mrf.mxu0 }
  0xc4   :  { %v93_v34 = vadd.f32 %v295_v32, %v92_v33 }
  0xc5   :  { %v339_v35 = vpop.f32.mrf.mxu0 }
  0xc6   :  { %v96_v36 = vmax.f32 %v93_v34, 0.0 }
  0xc8   :  { %373 = vmatmul.mubr.f32.vlgmr.msra.gmra.mxu1 %v96_v36 }
 0x188   :  { %v184_v41 = vpop.f32.mrf.mxu1 }
 0x189   :  { %v185_v42 = vadd.f32 %v297_v40, %v184_v41 }
 0x18a   :  { %v374_v43 = vpop.f32.mrf.mxu1 }
 0x18b   :  { %v188_v44 = vmax.f32 %v185_v42, 0.0 }
 0x18d   :  { %408 = vmatmul.mubr.f32.vlgmr.msra.gmra.mxu0 %v188_v44 }
 0x24d   :  { %v276_v46 = vpop.f32.mrf.mxu0 }
 0x24e   :  { %v277_v47 = vadd.f32 %v298_v45, %v276_v46 }
 0x24f   :  { %v409_v48 = vpop.f32.mrf.mxu0 }
 0x250   :  { %280 = vst [vmem:[#allocation2] sm:$0x3] %v277_v47 }
 0x251   :  { %424 = shalt.err (!%p421_p4)
}
 0x252   :  { %290 = dma.vmem_to_hbm [thread:$0]  %s288_s30, 32, %s614_s3, [#allocation3]  }
 0x253   :  { %433 = dma.done.wait [#allocation3], 32  }
 0x254   :  { %434 = vsyncadd [#allocation3], 4294967264 }
 0x255   :  { %294 = vsyncpa [#allocation3], 1 }

</bundles_post_ra>
